<compile_context>
chip_gen: v6e
topology: v6e:2x2x1
jax: 0.10.0
libtpu: 0.0.40
codegen_flags: <defaults>
</compile_context>

<pallas_src>
import functools

import jax
import jax.numpy as jnp
from jax.experimental import pallas as pl
from jax.experimental.pallas import tpu as pltpu


def _round_up(x: int, m: int) -> int:
    return ((x + m - 1) // m) * m


def _pick_tile(padded: int, align: int, cap: int) -> int:
    """Largest multiple of `align` that divides `padded` and is <= cap."""
    best = align
    q = padded // align
    for t in range(1, q + 1):
        if q % t == 0 and t * align <= cap:
            best = t * align
    return best


def _vmem_bytes(TM: int, TN: int, Kp: int, n_w: int, out_bytes: int) -> int:
    """Estimated VMEM for double-buffered pipeline blocks + compose scratch."""
    x_b = 2 * TM * Kp * 2            # bf16 x blocks
    w_b = n_w * 2 * Kp * TN * 2      # bf16 weight blocks (mu[,sigma,eps])
    b_b = 2 * 8 * TN * 4             # f32 stacked-bias blocks
    o_b = 2 * TM * TN * out_bytes    # output blocks
    sc_b = Kp * TN * 2               # composed-weight scratch (train)
    return x_b + w_b + b_b + o_b + sc_b


# ----------------------------------------------------------------------------
# Pallas kernels
# ----------------------------------------------------------------------------
def _noisy_linear_train_kernel(x_ref, wmu_ref, wsig_ref, weps_ref, b_ref,
                               o_ref, w_sc):
    # Compose the noisy weight once per N tile (first M step, M is the inner
    # "arbitrary" grid axis) and cache it in VMEM scratch for the M sweep.
    @pl.when(pl.program_id(1) == 0)
    def _():
        w_sc[...] = wmu_ref[...] + wsig_ref[...] * weps_ref[...]   # bf16 VPU

    b = b_ref[...]                                # (8, TN) f32: rows mu/sigma/eps
    bias = b[0:1, :] + b[1:2, :] * b[2:3, :]      # (1, TN) noisy bias
    acc = jnp.dot(x_ref[...], w_sc[...], preferred_element_type=jnp.float32)
    o_ref[...] = (acc + bias).astype(o_ref.dtype)


def _noisy_linear_eval_kernel(x_ref, w_ref, b_ref, o_ref):
    acc = jnp.dot(x_ref[...], w_ref[...], preferred_element_type=jnp.float32)
    o_ref[...] = (acc + b_ref[...][0:1, :]).astype(o_ref.dtype)


# ----------------------------------------------------------------------------
# One-time parameter layout (call again after re-sampling noise)
# ----------------------------------------------------------------------------
def prepare_noisy_linear_params(params):
    """Pre-transpose/pad weights to (Kp, Np) bf16; stack biases into (8, Np) f32.

    Done once per parameter/noise update instead of every forward call.
    """
    out_f, in_f = params["weight_mu"].shape
    Kp = _round_up(in_f, 128)
    Np = _round_up(out_f, 128)

    def lay_w(w):
        wt = jnp.transpose(w.astype(jnp.float32))
        wt = jnp.pad(wt, ((0, Kp - in_f), (0, Np - out_f)))
        return wt.astype(jnp.bfloat16)

    bias = jnp.zeros((8, Np), jnp.float32)
    bias = bias.at[0, :out_f].set(params["bias_mu"].astype(jnp.float32))
    bias = bias.at[1, :out_f].set(params["bias_sigma"].astype(jnp.float32))
    bias = bias.at[2, :out_f].set(params["bias_epsilon"].astype(jnp.float32))

    return {
        "w_mu": lay_w(params["weight_mu"]),
        "w_sigma": lay_w(params["weight_sigma"]),
        "w_eps": lay_w(params["weight_epsilon"]),
        "bias": bias,
    }


# ----------------------------------------------------------------------------
# Forward wrapper
# ----------------------------------------------------------------------------
def noisy_linear(x, prepared, *, out_features, training=True,
                 tm=512, tn=512, out_dtype=jnp.float32):
    """Fused NoisyLinear forward.

    x:        (..., in_features) float array
    prepared: output of prepare_noisy_linear_params (pre-laid-out bf16 weights)
    """
    Kp, Np = prepared["w_mu"].shape
    lead = x.shape[:-1]
    K = x.shape[-1]
    x2 = x.reshape(-1, K)
    M = x2.shape[0]

    # ---- tile selection (tiles divide the 16/128-rounded padded sizes) ----
    Mp = _round_up(max(M, 1), 16)
    TM = _pick_tile(Mp, 16, max(tm, 16))
    TN = _pick_tile(Np, 128, max(tn, 128))

    # v7x megacore: keep >=2 tiles on the "parallel" N axis when possible.
    if Np // TN < 2 and Np >= 256:
        TN = _pick_tile(Np, 128, Np // 2)

    # ---- VMEM budgeting: shrink tiles until the pipeline fits ----
    out_bytes = jnp.dtype(out_dtype).itemsize
    n_w = 3 if training else 1
    budget = 44 << 20
    while (_vmem_bytes(TM, TN, Kp, n_w, out_bytes) > budget
           and (TN > 128 or TM > 16)):
        if TN > 128:
            TN = _pick_tile(Np, 128, TN // 2)
        else:
            TM = _pick_tile(Mp, 16, TM // 2)
    vmem_limit = min(
        max(_vmem_bytes(TM, TN, Kp, n_w, out_bytes) + (8 << 20), 32 << 20),
        60 << 20)

    # Only x is (re)laid out per call; weights come pre-padded / pre-cast.
    xp = jnp.pad(x2.astype(jnp.bfloat16), ((0, Mp - M), (0, Kp - K)))

    grid = (Np // TN, Mp // TM)                   # N outer, M inner

    x_spec = pl.BlockSpec((TM, Kp), lambda j, m: (m, 0))
    w_spec = pl.BlockSpec((Kp, TN), lambda j, m: (0, j))
    b_spec = pl.BlockSpec((8, TN), lambda j, m: (0, j))
    o_spec = pl.BlockSpec((TM, TN), lambda j, m: (m, j))

    if training:
        out = pl.pallas_call(
            _noisy_linear_train_kernel,
            out_shape=jax.ShapeDtypeStruct((Mp, Np), out_dtype),
            grid_spec=pltpu.PrefetchScalarGridSpec(
                num_scalar_prefetch=0,
                grid=grid,
                in_specs=[x_spec, w_spec, w_spec, w_spec, b_spec],
                out_specs=o_spec,
                scratch_shapes=[pltpu.VMEM((Kp, TN), jnp.bfloat16)],
            ),
            compiler_params=pltpu.CompilerParams(
                # M (inner) reuses the scratch-cached composed weight ->
                # "arbitrary"; N (outer) tiles are independent -> "parallel".
                dimension_semantics=("parallel", "arbitrary"),
                vmem_limit_bytes=vmem_limit),
        )(xp, prepared["w_mu"], prepared["w_sigma"], prepared["w_eps"],
          prepared["bias"])
    else:
        out = pl.pallas_call(
            _noisy_linear_eval_kernel,
            out_shape=jax.ShapeDtypeStruct((Mp, Np), out_dtype),
            grid_spec=pltpu.PrefetchScalarGridSpec(
                num_scalar_prefetch=0,
                grid=grid,
                in_specs=[x_spec, w_spec, b_spec],
                out_specs=o_spec,
            ),
            compiler_params=pltpu.CompilerParams(
                dimension_semantics=("parallel", "parallel"),
                vmem_limit_bytes=vmem_limit),
        )(xp, prepared["w_mu"], prepared["bias"])

    return out[:M, :out_features].reshape(lead + (out_features,))


# ----------------------------------------------------------------------------
# Deterministic parameter construction (mirrors reset_parameters/sample_noise)
# ----------------------------------------------------------------------------
def init_noisy_linear_params(key, in_features, out_features, std_init=0.5):
    k0, k1, k2, k3 = jax.random.split(key, 4)
    mu_range = 1.0 / (in_features ** 0.5)
    sigma_init = std_init / (in_features ** 0.5)
    return {
        "weight_mu": jax.random.uniform(
            k0, (out_features, in_features), jnp.float32, -mu_range, mu_range),
        "weight_sigma": jnp.full(
            (out_features, in_features), sigma_init, jnp.float32),
        "weight_epsilon": jax.random.normal(
            k1, (out_features, in_features), jnp.float32),
        "bias_mu": jax.random.uniform(
            k2, (out_features,), jnp.float32, -mu_range, mu_range),
        "bias_sigma": jnp.full((out_features,), sigma_init, jnp.float32),
        "bias_epsilon": jax.random.normal(k3, (out_features,), jnp.float32),
    }


# ----------------------------------------------------------------------------
# Driver
# ----------------------------------------------------------------------------
if __name__ == "__main__":
    key = jax.random.PRNGKey(0)
    k_param, k_param2, k_in1, k_in2 = jax.random.split(key, 4)

    # --- Test 1: small inference-style shape (single-tile grid) ---
    in_f, out_f = 512, 96                # exercises N padding to 128 lanes
    params = init_noisy_linear_params(k_param, in_f, out_f)
    prep = prepare_noisy_linear_params(params)
    x = jax.random.normal(k_in1, (2, in_f), jnp.float32)

    fwd_train = jax.jit(functools.partial(
        noisy_linear, out_features=out_f, training=True))
    fwd_eval = jax.jit(functools.partial(
        noisy_linear, out_features=out_f, training=False))

    y_tr = fwd_train(x, prep)
    y_ev = fwd_eval(x, prep)
    jax.block_until_ready((y_tr, y_ev))

    # Plain-JAX f32 reference — loose tolerance since the kernel feeds the MXU
    # bf16 operands (f32 accumulation).
    w_eff = params["weight_mu"] + params["weight_sigma"] * params["weight_epsilon"]
    b_eff = params["bias_mu"] + params["bias_sigma"] * params["bias_epsilon"]
    ref_tr = x @ w_eff.T + b_eff
    ref_ev = x @ params["weight_mu"].T + params["bias_mu"]

    assert y_tr.shape == (2, out_f), y_tr.shape
    assert y_ev.shape == (2, out_f), y_ev.shape
    assert bool(jnp.allclose(y_tr, ref_tr, rtol=5e-2, atol=5e-2))
    assert bool(jnp.allclose(y_ev, ref_ev, rtol=5e-2, atol=5e-2))

    # --- Test 2: multi-tile grid (M tiles and N tiles > 1, training mode) ---
    # Exercises the per-N-tile composed-weight scratch cache across M steps
    # and the N-outer / M-inner grid ordering assumption.
    in_f2, out_f2 = 256, 384
    params2 = init_noisy_linear_params(k_param2, in_f2, out_f2)
    prep2 = prepare_noisy_linear_params(params2)
    x2 = jax.random.normal(k_in2, (5, 8, in_f2), jnp.float32)     # M = 40

    fwd_train2 = jax.jit(functools.partial(
        noisy_linear, out_features=out_f2, training=True, tm=16, tn=128))
    y2 = fwd_train2(x2, prep2)                                    # grid (3, 3)
    jax.block_until_ready(y2)

    w_eff2 = (params2["weight_mu"]
              + params2["weight_sigma"] * params2["weight_epsilon"])
    b_eff2 = (params2["bias_mu"]
              + params2["bias_sigma"] * params2["bias_epsilon"])
    ref2 = x2 @ w_eff2.T + b_eff2
    assert y2.shape == (5, 8, out_f2), y2.shape
    assert bool(jnp.allclose(y2, ref2, rtol=5e-2, atol=5e-2))

    print("KERNEL_OK")
</pallas_src>

<mosaic_0001>
module attributes {stable_mosaic.version = 11 : i64} {
  func.func @_noisy_linear_train_kernel(%arg0: i32, %arg1: i32, %arg2: memref<16x512xbf16, #tpu.memory_space<vmem>>, %arg3: memref<512x128xbf16, #tpu.memory_space<vmem>>, %arg4: memref<512x128xbf16, #tpu.memory_space<vmem>>, %arg5: memref<512x128xbf16, #tpu.memory_space<vmem>>, %arg6: memref<8x128xf32, #tpu.memory_space<vmem>>, %arg7: memref<16x128xf32, #tpu.memory_space<vmem>>, %arg8: memref<512x128xbf16, #tpu.memory_space<vmem>>) attributes {dimension_semantics = [#tpu.dimension_semantics<parallel>, #tpu.dimension_semantics<arbitrary>], iteration_bounds = array<i64: 1, 1>, scalar_prefetch = 0 : i64, scratch_operands = 1 : i64, tpu.core_type = #tpu.core_type<tc>, window_params = [{transform_indices = @transform_0, window_bounds = array<i64: 16, 512>}, {transform_indices = @transform_1, window_bounds = array<i64: 512, 128>}, {transform_indices = @transform_2, window_bounds = array<i64: 512, 128>}, {transform_indices = @transform_3, window_bounds = array<i64: 512, 128>}, {transform_indices = @transform_4, window_bounds = array<i64: 8, 128>}, {transform_indices = @transform_5, window_bounds = array<i64: 16, 128>}]} {
    %c0_i32 = arith.constant 0 : i32
    %0 = arith.cmpi eq, %arg1, %c0_i32 : i32
    %1 = arith.extui %0 : i1 to i32
    %c0_i32_0 = arith.constant 0 : i32
    %2 = arith.cmpi ne, %1, %c0_i32_0 : i32
    scf.if %2 {
      %c0_8 = arith.constant 0 : index
      %c0_9 = arith.constant 0 : index
      %15 = vector.load %arg3[%c0_8, %c0_9] : memref<512x128xbf16, #tpu.memory_space<vmem>>, vector<512x128xbf16>
      %c0_10 = arith.constant 0 : index
      %c0_11 = arith.constant 0 : index
      %16 = vector.load %arg4[%c0_10, %c0_11] : memref<512x128xbf16, #tpu.memory_space<vmem>>, vector<512x128xbf16>
      %c0_12 = arith.constant 0 : index
      %c0_13 = arith.constant 0 : index
      %17 = vector.load %arg5[%c0_12, %c0_13] : memref<512x128xbf16, #tpu.memory_space<vmem>>, vector<512x128xbf16>
      %18 = arith.mulf %16, %17 : vector<512x128xbf16>
      %19 = arith.addf %15, %18 : vector<512x128xbf16>
      %c0_14 = arith.constant 0 : index
      %c0_15 = arith.constant 0 : index
      %20 = vector.load %arg8[%c0_14, %c0_15] : memref<512x128xbf16, #tpu.memory_space<vmem>>, vector<512x128xbf16>
      tpu.vector_store %arg8[%c0_14, %c0_15], %19 {strides = array<i32>} : memref<512x128xbf16, #tpu.memory_space<vmem>>, vector<512x128xbf16>,
    } else {
    }
    %c0 = arith.constant 0 : index
    %c0_1 = arith.constant 0 : index
    %3 = vector.load %arg6[%c0, %c0_1] : memref<8x128xf32, #tpu.memory_space<vmem>>, vector<8x128xf32>
    %4 = vector.extract_strided_slice %3 {offsets = [0, 0], sizes = [1, 128], strides = [1, 1]} : vector<8x128xf32> to vector<1x128xf32>
    %5 = vector.extract_strided_slice %3 {offsets = [1, 0], sizes = [1, 128], strides = [1, 1]} : vector<8x128xf32> to vector<1x128xf32>
    %6 = vector.extract_strided_slice %3 {offsets = [2, 0], sizes = [1, 128], strides = [1, 1]} : vector<8x128xf32> to vector<1x128xf32>
    %7 = arith.mulf %5, %6 : vector<1x128xf32>
    %8 = arith.addf %4, %7 : vector<1x128xf32>
    %c0_2 = arith.constant 0 : index
    %c0_3 = arith.constant 0 : index
    %9 = vector.load %arg2[%c0_2, %c0_3] : memref<16x512xbf16, #tpu.memory_space<vmem>>, vector<16x512xbf16>
    %c0_4 = arith.constant 0 : index
    %c0_5 = arith.constant 0 : index
    %10 = vector.load %arg8[%c0_4, %c0_5] : memref<512x128xbf16, #tpu.memory_space<vmem>>, vector<512x128xbf16>
    %cst = arith.constant dense<0.000000e+00> : vector<16x128xf32>
    %11 = tpu.matmul %9, %10, %cst {dimension_numbers = #tpu.dot_dimension_numbers<[1], [0], [0], [1], [0, 0, 1, 1], [], []>} : vector<16x512xbf16>, vector<512x128xbf16>, vector<16x128xf32> -> vector<16x128xf32>
    %12 = vector.broadcast %8 : vector<1x128xf32> to vector<16x128xf32>
    %13 = arith.addf %11, %12 : vector<16x128xf32>
    %c0_6 = arith.constant 0 : index
    %c0_7 = arith.constant 0 : index
    %14 = vector.load %arg7[%c0_6, %c0_7] : memref<16x128xf32, #tpu.memory_space<vmem>>, vector<16x128xf32>
    tpu.vector_store %arg7[%c0_6, %c0_7], %13 {strides = array<i32>} : memref<16x128xf32, #tpu.memory_space<vmem>>, vector<16x128xf32>,
    return
  }
  func.func @transform_0(%arg0: i32, %arg1: i32) -> (i32, i32) {
    %c0_i32 = arith.constant 0 : i32
    %c0_i32_0 = arith.constant 0 : i32
    return %arg1, %c0_i32 : i32, i32
  }
  func.func @transform_1(%arg0: i32, %arg1: i32) -> (i32, i32) {
    %c0_i32 = arith.constant 0 : i32
    %c0_i32_0 = arith.constant 0 : i32
    return %c0_i32, %arg0 : i32, i32
  }
  func.func @transform_2(%arg0: i32, %arg1: i32) -> (i32, i32) {
    %c0_i32 = arith.constant 0 : i32
    %c0_i32_0 = arith.constant 0 : i32
    return %c0_i32, %arg0 : i32, i32
  }
  func.func @transform_3(%arg0: i32, %arg1: i32) -> (i32, i32) {
    %c0_i32 = arith.constant 0 : i32
    %c0_i32_0 = arith.constant 0 : i32
    return %c0_i32, %arg0 : i32, i32
  }
  func.func @transform_4(%arg0: i32, %arg1: i32) -> (i32, i32) {
    %c0_i32 = arith.constant 0 : i32
    %c0_i32_0 = arith.constant 0 : i32
    return %c0_i32, %arg0 : i32, i32
  }
  func.func @transform_5(%arg0: i32, %arg1: i32) -> (i32, i32) {
    %c0_i32 = arith.constant 0 : i32
    return %arg1, %arg0 : i32, i32
  }
}

</mosaic_0001>

<bundles_post_ra>
// kernel: noisy_linear.1
= control target key start
LH: loop header
LB: loop body
LE: loop exit
PB: predicated region body
PF: predicated region fallthrough
CT: control target
= control target key end

     0   :  { %10 = vsyncpa [#allocation4], 0  ;;  %s1308_s0 = inlined_call_operand.vmem [shape: bf16[16,512], index: 0, kind: input, shape index: {}]   ;;  %s1309_s1 = inlined_call_operand.hbm [shape: bf16[512,128], index: 1, kind: input, shape index: {}]   ;;  %s1310_s2 = inlined_call_operand.hbm [shape: bf16[512,128], index: 2, kind: input, shape index: {}]   ;;  %s1311_s3 = inlined_call_operand.hbm [shape: bf16[512,128], index: 3, kind: input, shape index: {}]   ;;  %s1312_s4 = inlined_call_operand.vmem [shape: f32[8,128], index: 4, kind: input, shape index: {}]   ;;  %s1313_s5 = inlined_call_operand.vmem [shape: f32[16,128], index: 5, kind: output, shape index: {}]  }
   0x1   :  { %11 = vsyncpa [#allocation6], 0  ;;  %s1243_s18 = smov [#allocation5]   ;;  %s1244_s20 = smov [#allocation3]  }
   0x2   :  { %s31_s19 = sshll.u32 %s1243_s18, 4  ;;  %s19_s21 = sshll.u32 %s1244_s20, 4  ;;  %s32_s19 = int_to_ptr.vmem [resolvable:$true] %s31_s19  ;;  %s20_s21 = int_to_ptr.vmem [resolvable:$true] %s19_s21 }
   0x3   :  { %s1187_s22 = scalar_lea.vmem %s32_s19, 4096  ;;  %p1192_p1 = scmp.lt.s32.totalorder %s32_s19, %s32_s19 }
   0x4   :  { %p1188_p0 = scmp.ne.s32.totalorder %s32_s19, %s1187_s22  ;;  %p1193_p2 = scmp.lt.s32.totalorder %s1187_s22, %s1187_s22 }
   0x6   :  { %p1194_p3 = por %p1193_p2, %p1192_p1 }
   0x8   :  { %p1195_p4 = pnand %p1194_p3, %p1188_p0 }
   0xa   :  { %1198 = shalt.err (!%p1195_p4)
}
   0xb   :  { %s1245_s23 = smov 64   ;;  %s1246_s24 = smov 4  }
   0xc   :  { %37 = dma.hbm_to_vmem [thread:$0]  %s1310_s2, 4096, %s32_s19, [#allocation6], %s1245_s23, %s1245_s23, %s1246_s24  }
   0xd   :  { %s1207_s27 = scalar_lea.vmem %s20_s21, 4096  ;;  %p1212_p6 = scmp.lt.s32.totalorder %s20_s21, %s20_s21 }
   0xe   :  { %p1208_p5 = scmp.ne.s32.totalorder %s20_s21, %s1207_s27  ;;  %p1213_p7 = scmp.lt.s32.totalorder %s1207_s27, %s1207_s27 }
  0x10   :  { %p1214_p8 = por %p1213_p7, %p1212_p6 }
  0x12   :  { %p1215_p9 = pnand %p1214_p8, %p1208_p5 }
  0x14   :  { %1218 = shalt.err (!%p1215_p9)
}
  0x15   :  { %25 = dma.hbm_to_vmem [thread:$0]  %s1309_s1, 4096, %s20_s21, [#allocation4], %s1245_s23, %s1245_s23, %s1246_s24  }
  0x16   :  { %s1247_s30 = smov [#allocation7]  }
  0x17   :  { %s43_s6 = sshll.u32 %s1247_s30, 4  ;;  %s44_s6 = int_to_ptr.vmem [resolvable:$true] %s43_s6 }
  0x18   :  { %s1227_s7 = scalar_lea.vmem %s44_s6, 4096  ;;  %p1232_p11 = scmp.lt.s32.totalorder %s44_s6, %s44_s6 }
  0x19   :  { %p1228_p10 = scmp.ne.s32.totalorder %s44_s6, %s1227_s7  ;;  %p1233_p12 = scmp.lt.s32.totalorder %s1227_s7, %s1227_s7 }
  0x1b   :  { %p1234_p13 = por %p1233_p12, %p1232_p11 }
  0x1d   :  { %p1235_p0 = pnand %p1234_p13, %p1228_p10 }
  0x1f   :  { %1238 = shalt.err (!%p1235_p0)
}
  0x20   :  { %49 = dma.hbm_to_vmem [thread:$0]  %s1311_s3, 4096, %s44_s6, [#allocation6], %s1245_s23, %s1245_s23, %s1246_s24  }
  0x21   :  { %1239 = dma.done.wait [#allocation4], 4096  }
  0x22   :  { %1240 = vsyncadd [#allocation4], 4294963200 }
  0x23   :  { %1241 = dma.done.wait [#allocation6], 8192  }
  0x24   :  { %1242 = vsyncadd [#allocation6], 4294959104  ;;  %v96_v0 = vld [vmem:[#allocation3 + $0x78] sm:$0xf]  ;;  %v97_v1 = vld [vmem:[#allocation3 + $0x7c] sm:$0xf] }
  0x25   :  { %v160_v2 = vld [vmem:[#allocation5 + $0x78] sm:$0xf]  ;;  %v161_v3 = vld [vmem:[#allocation5 + $0x7c] sm:$0xf]  ;;  %v94_v39 = vld [vmem:[#allocation3 + $0x70] sm:$0xf] }
  0x26   :  { %v224_v4 = vld [vmem:[#allocation7 + $0x78] sm:$0xf]  ;;  %v225_v5 = vld [vmem:[#allocation7 + $0x7c] sm:$0xf]  ;;  %v95_v40 = vld [vmem:[#allocation3 + $0x74] sm:$0xf] }
  0x27   :  { %v288_v6 = vmul.bf16 %v224_v4, %v160_v2  ;;  %v289_v7 = vmul.bf16 %v225_v5, %v161_v3  ;;  %v128_v8 = vld [vmem:[#allocation3 + $0xf8] sm:$0xf]  ;;  %v129_v9 = vld [vmem:[#allocation3 + $0xfc] sm:$0xf]  ;;  %v158_v41 = vld [vmem:[#allocation5 + $0x70] sm:$0xf] }
  0x28   :  { %v192_v10 = vld [vmem:[#allocation5 + $0xf8] sm:$0xf]  ;;  %v193_v11 = vld [vmem:[#allocation5 + $0xfc] sm:$0xf]  ;;  %v159_v43 = vld [vmem:[#allocation5 + $0x74] sm:$0xf] }
  0x29   :  { %v256_v12 = vld [vmem:[#allocation7 + $0xf8] sm:$0xf]  ;;  %v257_v13 = vld [vmem:[#allocation7 + $0xfc] sm:$0xf]  ;;  %v352_v14 = vadd.bf16 %v288_v6, %v96_v0  ;;  %v353_v15 = vadd.bf16 %v289_v7, %v97_v1  ;;  %v222_v44 = vld [vmem:[#allocation7 + $0x70] sm:$0xf] }
  0x2a   :  { %v320_v16 = vmul.bf16 %v256_v12, %v192_v10  ;;  %v321_v17 = vmul.bf16 %v257_v13, %v193_v11  ;;  %v80_v18 = vld [vmem:[#allocation3 + $0x38] sm:$0xf]  ;;  %v81_v19 = vld [vmem:[#allocation3 + $0x3c] sm:$0xf]  ;;  %v223_v45 = vld [vmem:[#allocation7 + $0x74] sm:$0xf]  ;;  %v286_v48 = vmul.bf16 %v222_v44, %v158_v41 }
  0x2b   :  { %v144_v20 = vld [vmem:[#allocation5 + $0x38] sm:$0xf]  ;;  %v145_v21 = vld [vmem:[#allocation5 + $0x3c] sm:$0xf]  ;;  %v1058_v24 = vcombine.low %v352_v14, %v353_v15  ;;  %v287_v49 = vmul.bf16 %v223_v45, %v159_v43  ;;  %v126_v50 = vld [vmem:[#allocation3 + $0xf0] sm:$0xf] }
  0x2c   :  { %v208_v22 = vld [vmem:[#allocation7 + $0x38] sm:$0xf]  ;;  %v209_v23 = vld [vmem:[#allocation7 + $0x3c] sm:$0xf]  ;;  %v384_v25 = vadd.bf16 %v320_v16, %v128_v8  ;;  %v385_v26 = vadd.bf16 %v321_v17, %v129_v9  ;;  %v127_v51 = vld [vmem:[#allocation3 + $0xf4] sm:$0xf]  ;;  %v350_v58 = vadd.bf16 %v286_v48, %v94_v39 }
  0x2d   :  { %v272_v27 = vmul.bf16 %v208_v22, %v144_v20  ;;  %v112_v28 = vld [vmem:[#allocation3 + $0xb8] sm:$0xf]  ;;  %v113_v29 = vld [vmem:[#allocation3 + $0xbc] sm:$0xf]  ;;  %v273_v31 = vmul.bf16 %v209_v23, %v145_v21  ;;  %1059 = vst [vmem:[#allocation2 + $0x78] sm:$0xff] %v1058_v24   ;;  %v351_v59 = vadd.bf16 %v287_v49, %v95_v40 }
  0x2e   :  { %v176_v30 = vld [vmem:[#allocation5 + $0xb8] sm:$0xf]  ;;  %v177_v32 = vld [vmem:[#allocation5 + $0xbc] sm:$0xf]  ;;  %v1090_v35 = vcombine.low %v384_v25, %v385_v26  ;;  %v190_v52 = vld [vmem:[#allocation5 + $0xf0] sm:$0xf] }
  0x2f   :  { %v240_v33 = vld [vmem:[#allocation7 + $0xb8] sm:$0xf]  ;;  %v241_v34 = vld [vmem:[#allocation7 + $0xbc] sm:$0xf]  ;;  %v336_v36 = vadd.bf16 %v272_v27, %v80_v18  ;;  %v337_v42 = vadd.bf16 %v273_v31, %v81_v19  ;;  %v191_v54 = vld [vmem:[#allocation5 + $0xf4] sm:$0xf]  ;;  %v1056_v4 = vcombine.low %v350_v58, %v351_v59 }
  0x30   :  { %v304_v37 = vmul.bf16 %v240_v33, %v176_v30  ;;  %v305_v38 = vmul.bf16 %v241_v34, %v177_v32  ;;  %1091 = vst [vmem:[#allocation2 + $0xf8] sm:$0xff] %v1090_v35   ;;  %v254_v55 = vld [vmem:[#allocation7 + $0xf0] sm:$0xf]  ;;  %v255_v56 = vld [vmem:[#allocation7 + $0xf4] sm:$0xf] }
  0x31   :  { %v1042_v53 = vcombine.low %v336_v36, %v337_v42  ;;  %v318_v60 = vmul.bf16 %v254_v55, %v190_v52  ;;  %v78_v61 = vld [vmem:[#allocation3 + $0x30] sm:$0xf]  ;;  %v79_v62 = vld [vmem:[#allocation3 + $0x34] sm:$0xf]  ;;  %v319_v0 = vmul.bf16 %v255_v56, %v191_v54  ;;  %1057 = vst [vmem:[#allocation2 + $0x70] sm:$0xff] %v1056_v4  }
  0x32   :  { %v368_v46 = vadd.bf16 %v304_v37, %v112_v28  ;;  %v369_v47 = vadd.bf16 %v305_v38, %v113_v29  ;;  %v142_v63 = vld [vmem:[#allocation5 + $0x30] sm:$0xf]  ;;  %v143_v1 = vld [vmem:[#allocation5 + $0x34] sm:$0xf]  ;;  %v92_v23 = vld [vmem:[#allocation3 + $0x68] sm:$0xf] }
  0x33   :  { %1043 = vst [vmem:[#allocation2 + $0x38] sm:$0xff] %v1042_v53   ;;  %v206_v2 = vld [vmem:[#allocation7 + $0x30] sm:$0xf]  ;;  %v207_v3 = vld [vmem:[#allocation7 + $0x34] sm:$0xf]  ;;  %v382_v5 = vadd.bf16 %v318_v60, %v126_v50  ;;  %v383_v12 = vadd.bf16 %v319_v0, %v127_v51 }
  0x34   :  { %v1074_v57 = vcombine.low %v368_v46, %v369_v47  ;;  %v270_v6 = vmul.bf16 %v206_v2, %v142_v63  ;;  %v271_v7 = vmul.bf16 %v207_v3, %v143_v1  ;;  %v110_v8 = vld [vmem:[#allocation3 + $0xb0] sm:$0xf]  ;;  %v111_v9 = vld [vmem:[#allocation3 + $0xb4] sm:$0xf]  ;;  %v1141_v11 = vld [vmem:[#allocation2 + $0x78] sm:$0xff]  }
  0x35   :  { %v174_v10 = vld [vmem:[#allocation5 + $0xb0] sm:$0xf]  ;;  %v175_v15 = vld [vmem:[#allocation5 + $0xb4] sm:$0xf]  ;;  %1092 = vmatprep.subr.bf16.mxu0 %v1141_v11  ;;  %v1088_v19 = vcombine.low %v382_v5, %v383_v12  ;;  %v93_v24 = vld [vmem:[#allocation3 + $0x6c] sm:$0xf] }
  0x36   :  { %1075 = vst [vmem:[#allocation2 + $0xb8] sm:$0xff] %v1074_v57   ;;  %v334_v13 = vadd.bf16 %v270_v6, %v78_v61  ;;  %v335_v14 = vadd.bf16 %v271_v7, %v79_v62  ;;  %v238_v16 = vld [vmem:[#allocation7 + $0xb0] sm:$0xf]  ;;  %v239_v17 = vld [vmem:[#allocation7 + $0xb4] sm:$0xf] }
  0x37   :  { %v1142_v18 = vld [vmem:[#allocation2 + $0xf8] sm:$0xff]   ;;  %v302_v20 = vmul.bf16 %v238_v16, %v174_v10  ;;  %v303_v21 = vmul.bf16 %v239_v17, %v175_v15  ;;  %v156_v25 = vld [vmem:[#allocation5 + $0x68] sm:$0xf]  ;;  %1089 = vst [vmem:[#allocation2 + $0xf0] sm:$0xff] %v1088_v19   ;;  %v157_v28 = vld [vmem:[#allocation5 + $0x6c] sm:$0xf] }
  0x38   :  { %v1040_v22 = vcombine.low %v334_v13, %v335_v14  ;;  %1114 = vmatprep.subr.bf16.mxu1 %v1142_v18  ;;  %v220_v29 = vld [vmem:[#allocation7 + $0x68] sm:$0xf]  ;;  %v221_v30 = vld [vmem:[#allocation7 + $0x6c] sm:$0xf]  ;;  %v1145_v41 = vld [vmem:[#allocation2 + $0x70] sm:$0xff]  }
  0x39   :  { %v366_v26 = vadd.bf16 %v302_v20, %v110_v8  ;;  %v367_v27 = vadd.bf16 %v303_v21, %v111_v9  ;;  %v284_v32 = vmul.bf16 %v220_v29, %v156_v25  ;;  %v285_v33 = vmul.bf16 %v221_v30, %v157_v28  ;;  %v124_v38 = vld [vmem:[#allocation3 + $0xe8] sm:$0xf]  ;;  %v125_v39 = vld [vmem:[#allocation3 + $0xec] sm:$0xf]  ;;  %v90_v8 = vld [vmem:[#allocation3 + $0x60] sm:$0xf] }
  0x3a   :  { %v1143_v31 = vld [vmem:[#allocation2 + $0x38] sm:$0xff]   ;;  %1041 = vst [vmem:[#allocation2 + $0x30] sm:$0xff] %v1040_v22   ;;  %v188_v40 = vld [vmem:[#allocation5 + $0xe8] sm:$0xf]  ;;  %v189_v43 = vld [vmem:[#allocation5 + $0xec] sm:$0xf] }
  0x3b   :  { %v1072_v35 = vcombine.low %v366_v26, %v367_v27  ;;  %1093 = vmatpush3.bf16.msra.mxu0 %v1143_v31  ;;  %v348_v36 = vadd.bf16 %v284_v32, %v92_v23  ;;  %v349_v37 = vadd.bf16 %v285_v33, %v93_v24  ;;  %v252_v44 = vld [vmem:[#allocation7 + $0xe8] sm:$0xf]  ;;  %v253_v45 = vld [vmem:[#allocation7 + $0xec] sm:$0xf]  ;;  %v91_v9 = vld [vmem:[#allocation3 + $0x64] sm:$0xf] }
  0x3c   :  { %1094 = vmatprep.subr.bf16.mxu0 %v1145_v41  ;;  %v316_v46 = vmul.bf16 %v252_v44, %v188_v40  ;;  %v317_v47 = vmul.bf16 %v253_v45, %v189_v43  ;;  %v140_v48 = vld [vmem:[#allocation5 + $0x28] sm:$0xf]  ;;  %v77_v51 = vld [vmem:[#allocation3 + $0x2c] sm:$0xf]  ;;  %v154_v10 = vld [vmem:[#allocation5 + $0x60] sm:$0xf] }
  0x3d   :  { %v1144_v34 = vld [vmem:[#allocation2 + $0xb8] sm:$0xff]   ;;  %1073 = vst [vmem:[#allocation2 + $0xb0] sm:$0xff] %v1072_v35   ;;  %v1054_v42 = vcombine.low %v348_v36, %v349_v37  ;;  %v76_v50 = vld [vmem:[#allocation3 + $0x28] sm:$0xf]  ;;  %v141_v55 = vld [vmem:[#allocation5 + $0x2c] sm:$0xf] }
  0x3e   :  { %1115 = vmatpush3.bf16.msra.mxu1 %v1144_v34  ;;  %v1146_v49 = vld [vmem:[#allocation2 + $0xf0] sm:$0xff]   ;;  %v380_v53 = vadd.bf16 %v316_v46, %v124_v38  ;;  %v381_v54 = vadd.bf16 %v317_v47, %v125_v39  ;;  %v204_v56 = vld [vmem:[#allocation7 + $0x28] sm:$0xf]  ;;  %v205_v57 = vld [vmem:[#allocation7 + $0x2c] sm:$0xf] }
  0x3f   :  { %1055 = vst [vmem:[#allocation2 + $0x68] sm:$0xff] %v1054_v42   ;;  %1116 = vmatprep.subr.bf16.mxu1 %v1146_v49  ;;  %v268_v59 = vmul.bf16 %v204_v56, %v140_v48  ;;  %v269_v60 = vmul.bf16 %v205_v57, %v141_v55  ;;  %v108_v61 = vld [vmem:[#allocation3 + $0xa8] sm:$0xf]  ;;  %v109_v62 = vld [vmem:[#allocation3 + $0xac] sm:$0xf] }
  0x40   :  { %v1086_v58 = vcombine.low %v380_v53, %v381_v54  ;;  %v172_v63 = vld [vmem:[#allocation5 + $0xa8] sm:$0xf]  ;;  %v173_v3 = vld [vmem:[#allocation5 + $0xac] sm:$0xf]  ;;  %v155_v15 = vld [vmem:[#allocation5 + $0x64] sm:$0xf] }
  0x41   :  { %v1147_v52 = vld [vmem:[#allocation2 + $0x30] sm:$0xff]   ;;  %v332_v1 = vadd.bf16 %v268_v59, %v76_v50  ;;  %v333_v2 = vadd.bf16 %v269_v60, %v77_v51  ;;  %v236_v4 = vld [vmem:[#allocation7 + $0xa8] sm:$0xf]  ;;  %v237_v5 = vld [vmem:[#allocation7 + $0xac] sm:$0xf] }
  0x42   :  { %1095 = vmatpush3.bf16.msra.mxu0 %v1147_v52  ;;  %1087 = vst [vmem:[#allocation2 + $0xe8] sm:$0xff] %v1086_v58   ;;  %v300_v6 = vmul.bf16 %v236_v4, %v172_v63  ;;  %v301_v7 = vmul.bf16 %v237_v5, %v173_v3  ;;  %v218_v16 = vld [vmem:[#allocation7 + $0x60] sm:$0xf]  ;;  %v219_v17 = vld [vmem:[#allocation7 + $0x64] sm:$0xf] }
  0x43   :  { %v1038_v12 = vcombine.low %v332_v1, %v333_v2  ;;  %v282_v18 = vmul.bf16 %v218_v16, %v154_v10  ;;  %v283_v19 = vmul.bf16 %v219_v17, %v155_v15  ;;  %v122_v20 = vld [vmem:[#allocation3 + $0xe0] sm:$0xf]  ;;  %v123_v21 = vld [vmem:[#allocation3 + $0xe4] sm:$0xf]  ;;  %v88_v55 = vld [vmem:[#allocation3 + $0x58] sm:$0xf] }
  0x44   :  { %v1148_v0 = vld [vmem:[#allocation2 + $0xb0] sm:$0xff]   ;;  %v364_v13 = vadd.bf16 %v300_v6, %v108_v61  ;;  %v365_v14 = vadd.bf16 %v301_v7, %v109_v62  ;;  %v186_v22 = vld [vmem:[#allocation5 + $0xe0] sm:$0xf]  ;;  %v187_v24 = vld [vmem:[#allocation5 + $0xe4] sm:$0xf] }
  0x45   :  { %1117 = vmatpush3.bf16.msra.mxu1 %v1148_v0  ;;  %1039 = vst [vmem:[#allocation2 + $0x28] sm:$0xff] %v1038_v12   ;;  %v250_v25 = vld [vmem:[#allocation7 + $0xe0] sm:$0xf]  ;;  %v251_v26 = vld [vmem:[#allocation7 + $0xe4] sm:$0xf]  ;;  %v346_v27 = vadd.bf16 %v282_v18, %v90_v8  ;;  %v347_v28 = vadd.bf16 %v283_v19, %v91_v9 }
  0x46   :  { %v1149_v11 = vld [vmem:[#allocation2 + $0x68] sm:$0xff]   ;;  %v1070_v23 = vcombine.low %v364_v13, %v365_v14  ;;  %v314_v29 = vmul.bf16 %v250_v25, %v186_v22  ;;  %v315_v30 = vmul.bf16 %v251_v26, %v187_v24  ;;  %v74_v31 = vld [vmem:[#allocation3 + $0x20] sm:$0xf]  ;;  %v75_v32 = vld [vmem:[#allocation3 + $0x24] sm:$0xf] }
  0x47   :  { %1096 = vmatprep.subr.bf16.mxu0 %v1149_v11  ;;  %v138_v33 = vld [vmem:[#allocation5 + $0x20] sm:$0xf]  ;;  %v1052_v35 = vcombine.low %v346_v27, %v347_v28  ;;  %v139_v38 = vld [vmem:[#allocation5 + $0x24] sm:$0xf]  ;;  %v89_v56 = vld [vmem:[#allocation3 + $0x5c] sm:$0xf] }
  0x48   :  { %1071 = vst [vmem:[#allocation2 + $0xa8] sm:$0xff] %v1070_v23   ;;  %v378_v36 = vadd.bf16 %v314_v29, %v122_v20  ;;  %v379_v37 = vadd.bf16 %v315_v30, %v123_v21  ;;  %v202_v39 = vld [vmem:[#allocation7 + $0x20] sm:$0xf]  ;;  %v203_v40 = vld [vmem:[#allocation7 + $0x24] sm:$0xf] }
  0x49   :  { %v1150_v34 = vld [vmem:[#allocation2 + $0xe8] sm:$0xff]   ;;  %v266_v41 = vmul.bf16 %v202_v39, %v138_v33  ;;  %v267_v42 = vmul.bf16 %v203_v40, %v139_v38  ;;  %v106_v43 = vld [vmem:[#allocation3 + $0xa0] sm:$0xf]  ;;  %v107_v44 = vld [vmem:[#allocation3 + $0xa4] sm:$0xf]  ;;  %1053 = vst [vmem:[#allocation2 + $0x60] sm:$0xff] %v1052_v35  }
  0x4a   :  { %1118 = vmatprep.subr.bf16.mxu1 %v1150_v34  ;;  %v170_v45 = vld [vmem:[#allocation5 + $0xa0] sm:$0xf]  ;;  %v1084_v46 = vcombine.low %v378_v36, %v379_v37  ;;  %v171_v47 = vld [vmem:[#allocation5 + $0xa4] sm:$0xf]  ;;  %v152_v57 = vld [vmem:[#allocation5 + $0x58] sm:$0xf] }
  0x4b   :  { %v234_v48 = vld [vmem:[#allocation7 + $0xa0] sm:$0xf]  ;;  %v235_v49 = vld [vmem:[#allocation7 + $0xa4] sm:$0xf]  ;;  %v330_v51 = vadd.bf16 %v266_v41, %v74_v31  ;;  %v331_v52 = vadd.bf16 %v267_v42, %v75_v32  ;;  %v153_v61 = vld [vmem:[#allocation5 + $0x5c] sm:$0xf] }
  0x4c   :  { %v1151_v50 = vld [vmem:[#allocation2 + $0x28] sm:$0xff]   ;;  %v298_v53 = vmul.bf16 %v234_v48, %v170_v45  ;;  %v299_v54 = vmul.bf16 %v235_v49, %v171_v47  ;;  %1085 = vst [vmem:[#allocation2 + $0xe0] sm:$0xff] %v1084_v46   ;;  %v216_v62 = vld [vmem:[#allocation7 + $0x58] sm:$0xf]  ;;  %v217_v63 = vld [vmem:[#allocation7 + $0x5c] sm:$0xf] }
  0x4d   :  { %1097 = vmatpush3.bf16.msra.mxu0 %v1151_v50  ;;  %v1036_v58 = vcombine.low %v330_v51, %v331_v52  ;;  %v280_v1 = vmul.bf16 %v216_v62, %v152_v57  ;;  %v281_v2 = vmul.bf16 %v217_v63, %v153_v61  ;;  %v120_v4 = vld [vmem:[#allocation3 + $0xd8] sm:$0xf]  ;;  %v121_v5 = vld [vmem:[#allocation3 + $0xdc] sm:$0xf]  ;;  %v86_v41 = vld [vmem:[#allocation3 + $0x50] sm:$0xf] }
  0x4e   :  { %v362_v59 = vadd.bf16 %v298_v53, %v106_v43  ;;  %v363_v60 = vadd.bf16 %v299_v54, %v107_v44  ;;  %v184_v6 = vld [vmem:[#allocation5 + $0xd8] sm:$0xf]  ;;  %v185_v9 = vld [vmem:[#allocation5 + $0xdc] sm:$0xf]  ;;  %v87_v42 = vld [vmem:[#allocation3 + $0x54] sm:$0xf] }
  0x4f   :  { %v1152_v0 = vld [vmem:[#allocation2 + $0xa8] sm:$0xff]   ;;  %1037 = vst [vmem:[#allocation2 + $0x20] sm:$0xff] %v1036_v58   ;;  %v344_v7 = vadd.bf16 %v280_v1, %v88_v55  ;;  %v345_v8 = vadd.bf16 %v281_v2, %v89_v56  ;;  %v248_v10 = vld [vmem:[#allocation7 + $0xd8] sm:$0xf]  ;;  %v249_v11 = vld [vmem:[#allocation7 + $0xdc] sm:$0xf] }
  0x50   :  { %v1068_v3 = vcombine.low %v362_v59, %v363_v60  ;;  %1119 = vmatpush3.bf16.msra.mxu1 %v1152_v0  ;;  %v1153_v12 = vld [vmem:[#allocation2 + $0x60] sm:$0xff]   ;;  %v312_v13 = vmul.bf16 %v248_v10, %v184_v6  ;;  %v313_v14 = vmul.bf16 %v249_v11, %v185_v9  ;;  %v72_v16 = vld [vmem:[#allocation3 + $0x18] sm:$0xf]  ;;  %v73_v17 = vld [vmem:[#allocation3 + $0x1c] sm:$0xf] }
  0x51   :  { %v1050_v15 = vcombine.low %v344_v7, %v345_v8  ;;  %v136_v18 = vld [vmem:[#allocation5 + $0x18] sm:$0xf]  ;;  %1098 = vmatprep.subr.bf16.mxu0 %v1153_v12  ;;  %v137_v22 = vld [vmem:[#allocation5 + $0x1c] sm:$0xf]  ;;  %v150_v43 = vld [vmem:[#allocation5 + $0x50] sm:$0xf] }
  0x52   :  { %1069 = vst [vmem:[#allocation2 + $0xa0] sm:$0xff] %v1068_v3   ;;  %v376_v20 = vadd.bf16 %v312_v13, %v120_v4  ;;  %v377_v21 = vadd.bf16 %v313_v14, %v121_v5  ;;  %v200_v23 = vld [vmem:[#allocation7 + $0x18] sm:$0xf]  ;;  %v201_v24 = vld [vmem:[#allocation7 + $0x1c] sm:$0xf] }
  0x53   :  { %v1154_v19 = vld [vmem:[#allocation2 + $0xe0] sm:$0xff]   ;;  %1051 = vst [vmem:[#allocation2 + $0x58] sm:$0xff] %v1050_v15   ;;  %v264_v26 = vmul.bf16 %v200_v23, %v136_v18  ;;  %v265_v27 = vmul.bf16 %v201_v24, %v137_v22  ;;  %v104_v28 = vld [vmem:[#allocation3 + $0x98] sm:$0xf]  ;;  %v105_v29 = vld [vmem:[#allocation3 + $0x9c] sm:$0xf] }
  0x54   :  { %1120 = vmatprep.subr.bf16.mxu1 %v1154_v19  ;;  %v1082_v25 = vcombine.low %v376_v20, %v377_v21  ;;  %v168_v30 = vld [vmem:[#allocation5 + $0x98] sm:$0xf]  ;;  %v169_v34 = vld [vmem:[#allocation5 + $0x9c] sm:$0xf]  ;;  %v151_v46 = vld [vmem:[#allocation5 + $0x54] sm:$0xf] }
  0x55   :  { %v328_v32 = vadd.bf16 %v264_v26, %v72_v16  ;;  %v329_v33 = vadd.bf16 %v265_v27, %v73_v17  ;;  %v232_v35 = vld [vmem:[#allocation7 + $0x98] sm:$0xf]  ;;  %v233_v36 = vld [vmem:[#allocation7 + $0x9c] sm:$0xf]  ;;  %v214_v47 = vld [vmem:[#allocation7 + $0x50] sm:$0xf] }
  0x56   :  { %v1155_v31 = vld [vmem:[#allocation2 + $0x20] sm:$0xff]   ;;  %1083 = vst [vmem:[#allocation2 + $0xd8] sm:$0xff] %v1082_v25   ;;  %v296_v38 = vmul.bf16 %v232_v35, %v168_v30  ;;  %v297_v39 = vmul.bf16 %v233_v36, %v169_v34  ;;  %v215_v48 = vld [vmem:[#allocation7 + $0x54] sm:$0xf]  ;;  %v278_v50 = vmul.bf16 %v214_v47, %v150_v43  ;;  %v118_v53 = vld [vmem:[#allocation3 + $0xd0] sm:$0xf] }
  0x57   :  { %1099 = vmatpush3.bf16.msra.mxu0 %v1155_v31  ;;  %v1034_v40 = vcombine.low %v328_v32, %v329_v33  ;;  %v279_v51 = vmul.bf16 %v215_v48, %v151_v46  ;;  %v119_v54 = vld [vmem:[#allocation3 + $0xd4] sm:$0xf]  ;;  %v182_v55 = vld [vmem:[#allocation5 + $0xd0] sm:$0xf]  ;;  %v84_v23 = vld [vmem:[#allocation3 + $0x48] sm:$0xf] }
  0x58   :  { %v360_v44 = vadd.bf16 %v296_v38, %v104_v28  ;;  %v361_v45 = vadd.bf16 %v297_v39, %v105_v29  ;;  %v342_v56 = vadd.bf16 %v278_v50, %v86_v41  ;;  %v183_v58 = vld [vmem:[#allocation5 + $0xd4] sm:$0xf]  ;;  %v246_v59 = vld [vmem:[#allocation7 + $0xd0] sm:$0xf]  ;;  %v85_v24 = vld [vmem:[#allocation3 + $0x4c] sm:$0xf] }
  0x59   :  { %v1156_v37 = vld [vmem:[#allocation2 + $0xa0] sm:$0xff]   ;;  %1035 = vst [vmem:[#allocation2 + $0x18] sm:$0xff] %v1034_v40   ;;  %v343_v57 = vadd.bf16 %v279_v51, %v87_v42  ;;  %v247_v60 = vld [vmem:[#allocation7 + $0xd4] sm:$0xf]  ;;  %v310_v62 = vmul.bf16 %v246_v59, %v182_v55  ;;  %v70_v1 = vld [vmem:[#allocation3 + $0x10] sm:$0xf] }
  0x5a   :  { %1121 = vmatpush3.bf16.msra.mxu1 %v1156_v37  ;;  %v1157_v49 = vld [vmem:[#allocation2 + $0x58] sm:$0xff]   ;;  %v1066_v52 = vcombine.low %v360_v44, %v361_v45  ;;  %v311_v63 = vmul.bf16 %v247_v60, %v183_v58  ;;  %v71_v2 = vld [vmem:[#allocation3 + $0x14] sm:$0xf]  ;;  %v134_v3 = vld [vmem:[#allocation5 + $0x10] sm:$0xf] }
  0x5b   :  { %1100 = vmatprep.subr.bf16.mxu0 %v1157_v49  ;;  %v1048_v0 = vcombine.low %v342_v56, %v343_v57  ;;  %v374_v4 = vadd.bf16 %v310_v62, %v118_v53  ;;  %v135_v6 = vld [vmem:[#allocation5 + $0x14] sm:$0xf]  ;;  %v198_v7 = vld [vmem:[#allocation7 + $0x10] sm:$0xf]  ;;  %v148_v25 = vld [vmem:[#allocation5 + $0x48] sm:$0xf] }
  0x5c   :  { %1067 = vst [vmem:[#allocation2 + $0x98] sm:$0xff] %v1066_v52   ;;  %v375_v5 = vadd.bf16 %v311_v63, %v119_v54  ;;  %v199_v8 = vld [vmem:[#allocation7 + $0x14] sm:$0xf]  ;;  %v262_v9 = vmul.bf16 %v198_v7, %v134_v3  ;;  %v102_v11 = vld [vmem:[#allocation3 + $0x90] sm:$0xf] }
  0x5d   :  { %v1158_v61 = vld [vmem:[#allocation2 + $0xd8] sm:$0xff]   ;;  %1049 = vst [vmem:[#allocation2 + $0x50] sm:$0xff] %v1048_v0   ;;  %v263_v10 = vmul.bf16 %v199_v8, %v135_v6  ;;  %v103_v12 = vld [vmem:[#allocation3 + $0x94] sm:$0xf]  ;;  %v166_v13 = vld [vmem:[#allocation5 + $0x90] sm:$0xf] }
  0x5e   :  { %1122 = vmatprep.subr.bf16.mxu1 %v1158_v61  ;;  %v1080_v15 = vcombine.low %v374_v4, %v375_v5  ;;  %v326_v16 = vadd.bf16 %v262_v9, %v70_v1  ;;  %v167_v18 = vld [vmem:[#allocation5 + $0x94] sm:$0xf]  ;;  %v230_v19 = vld [vmem:[#allocation7 + $0x90] sm:$0xf]  ;;  %v149_v30 = vld [vmem:[#allocation5 + $0x4c] sm:$0xf] }
  0x5f   :  { %v327_v17 = vadd.bf16 %v263_v10, %v71_v2  ;;  %v231_v20 = vld [vmem:[#allocation7 + $0x94] sm:$0xf]  ;;  %v294_v21 = vmul.bf16 %v230_v19, %v166_v13  ;;  %v212_v31 = vld [vmem:[#allocation7 + $0x48] sm:$0xf]  ;;  %v213_v32 = vld [vmem:[#allocation7 + $0x4c] sm:$0xf] }
  0x60   :  { %v1159_v14 = vld [vmem:[#allocation2 + $0x18] sm:$0xff]   ;;  %1081 = vst [vmem:[#allocation2 + $0xd0] sm:$0xff] %v1080_v15   ;;  %v295_v22 = vmul.bf16 %v231_v20, %v167_v18  ;;  %v276_v33 = vmul.bf16 %v212_v31, %v148_v25  ;;  %v277_v34 = vmul.bf16 %v213_v32, %v149_v30  ;;  %v116_v35 = vld [vmem:[#allocation3 + $0xc8] sm:$0xf]  ;;  %v117_v36 = vld [vmem:[#allocation3 + $0xcc] sm:$0xf] }
  0x61   :  { %1101 = vmatpush3.bf16.msra.mxu0 %v1159_v14  ;;  %v1032_v27 = vcombine.low %v326_v16, %v327_v17  ;;  %v358_v28 = vadd.bf16 %v294_v21, %v102_v11  ;;  %v180_v37 = vld [vmem:[#allocation5 + $0xc8] sm:$0xf]  ;;  %v181_v42 = vld [vmem:[#allocation5 + $0xcc] sm:$0xf]  ;;  %v82_v7 = vld [vmem:[#allocation3 + $0x40] sm:$0xf] }
  0x62   :  { %v359_v29 = vadd.bf16 %v295_v22, %v103_v12  ;;  %v340_v40 = vadd.bf16 %v276_v33, %v84_v23  ;;  %v341_v41 = vadd.bf16 %v277_v34, %v85_v24  ;;  %v244_v43 = vld [vmem:[#allocation7 + $0xc8] sm:$0xf]  ;;  %v245_v44 = vld [vmem:[#allocation7 + $0xcc] sm:$0xf]  ;;  %v83_v8 = vld [vmem:[#allocation3 + $0x44] sm:$0xf] }
  0x63   :  { %v1160_v26 = vld [vmem:[#allocation2 + $0x98] sm:$0xff]   ;;  %1033 = vst [vmem:[#allocation2 + $0x10] sm:$0xff] %v1032_v27   ;;  %v308_v45 = vmul.bf16 %v244_v43, %v180_v37  ;;  %v309_v46 = vmul.bf16 %v245_v44, %v181_v42  ;;  %v68_v47 = vld [vmem:[#allocation3 + $0x8] sm:$0xf]  ;;  %v69_v48 = vld [vmem:[#allocation3 + $0xc] sm:$0xf] }
  0x64   :  { %1123 = vmatpush3.bf16.msra.mxu1 %v1160_v26  ;;  %v1161_v38 = vld [vmem:[#allocation2 + $0x50] sm:$0xff]   ;;  %v1064_v39 = vcombine.low %v358_v28, %v359_v29  ;;  %v132_v49 = vld [vmem:[#allocation5 + $0x8] sm:$0xf]  ;;  %v1046_v51 = vcombine.low %v340_v40, %v341_v41  ;;  %v133_v54 = vld [vmem:[#allocation5 + $0xc] sm:$0xf] }
  0x65   :  { %1102 = vmatprep.subr.bf16.mxu0 %v1161_v38  ;;  %v372_v52 = vadd.bf16 %v308_v45, %v116_v35  ;;  %v373_v53 = vadd.bf16 %v309_v46, %v117_v36  ;;  %v196_v55 = vld [vmem:[#allocation7 + $0x8] sm:$0xf]  ;;  %v197_v56 = vld [vmem:[#allocation7 + $0xc] sm:$0xf]  ;;  %v146_v9 = vld [vmem:[#allocation5 + $0x40] sm:$0xf] }
  0x66   :  { %1065 = vst [vmem:[#allocation2 + $0x90] sm:$0xff] %v1064_v39   ;;  %1047 = vst [vmem:[#allocation2 + $0x48] sm:$0xff] %v1046_v51   ;;  %v260_v57 = vmul.bf16 %v196_v55, %v132_v49  ;;  %v261_v58 = vmul.bf16 %v197_v56, %v133_v54  ;;  %v100_v59 = vld [vmem:[#allocation3 + $0x88] sm:$0xf]  ;;  %v101_v60 = vld [vmem:[#allocation3 + $0x8c] sm:$0xf] }
  0x67   :  { %v1162_v50 = vld [vmem:[#allocation2 + $0xd0] sm:$0xff]   ;;  %v164_v61 = vld [vmem:[#allocation5 + $0x88] sm:$0xf]  ;;  %v1078_v63 = vcombine.low %v372_v52, %v373_v53  ;;  %v165_v2 = vld [vmem:[#allocation5 + $0x8c] sm:$0xf] }
  0x68   :  { %1124 = vmatprep.subr.bf16.mxu1 %v1162_v50  ;;  %v324_v0 = vadd.bf16 %v260_v57, %v68_v47  ;;  %v325_v1 = vadd.bf16 %v261_v58, %v69_v48  ;;  %v228_v3 = vld [vmem:[#allocation7 + $0x88] sm:$0xf]  ;;  %v229_v4 = vld [vmem:[#allocation7 + $0x8c] sm:$0xf]  ;;  %v147_v14 = vld [vmem:[#allocation5 + $0x44] sm:$0xf] }
  0x69   :  { %1079 = vst [vmem:[#allocation2 + $0xc8] sm:$0xff] %v1078_v63   ;;  %v292_v5 = vmul.bf16 %v228_v3, %v164_v61  ;;  %v293_v6 = vmul.bf16 %v229_v4, %v165_v2  ;;  %v210_v15 = vld [vmem:[#allocation7 + $0x40] sm:$0xf]  ;;  %v211_v16 = vld [vmem:[#allocation7 + $0x44] sm:$0xf] }
  0x6a   :  { %v1163_v62 = vld [vmem:[#allocation2 + $0x10] sm:$0xff]   ;;  %v1030_v11 = vcombine.low %v324_v0, %v325_v1  ;;  %v274_v17 = vmul.bf16 %v210_v15, %v146_v9  ;;  %v275_v18 = vmul.bf16 %v211_v16, %v147_v14  ;;  %v114_v19 = vld [vmem:[#allocation3 + $0xc0] sm:$0xf]  ;;  %v115_v20 = vld [vmem:[#allocation3 + $0xc4] sm:$0xf] }
  0x6b   :  { %1103 = vmatpush3.bf16.msra.mxu0 %v1163_v62  ;;  %v356_v12 = vadd.bf16 %v292_v5, %v100_v59  ;;  %v357_v13 = vadd.bf16 %v293_v6, %v101_v60  ;;  %v178_v21 = vld [vmem:[#allocation5 + $0xc0] sm:$0xf]  ;;  %v179_v26 = vld [vmem:[#allocation5 + $0xc4] sm:$0xf]  ;;  %v1178_v60 = vld [vmem:[%s1308_s0 + $0xc] ss:$16 sps:$4 sm:$0xff]  }
  0x6c   :  { %1031 = vst [vmem:[#allocation2 + $0x8] sm:$0xff] %v1030_v11   ;;  %v338_v24 = vadd.bf16 %v274_v17, %v82_v7  ;;  %v339_v25 = vadd.bf16 %v275_v18, %v83_v8  ;;  %v242_v27 = vld [vmem:[#allocation7 + $0xc0] sm:$0xf]  ;;  %v243_v28 = vld [vmem:[#allocation7 + $0xc4] sm:$0xf]  ;;  %816 = vmatprep.mubr.bf16.mxu1 %v1178_v60  ;;  %v527_v7 = vlaneseq }
  0x6d   :  { %v1164_v10 = vld [vmem:[#allocation2 + $0x90] sm:$0xff]   ;;  %v1165_v22 = vld [vmem:[#allocation2 + $0x48] sm:$0xff]   ;;  %v1062_v23 = vcombine.low %v356_v12, %v357_v13  ;;  %v306_v29 = vmul.bf16 %v242_v27, %v178_v21  ;;  %v307_v30 = vmul.bf16 %v243_v28, %v179_v26  ;;  %v66_v31 = vld [vmem:[#allocation3] sm:$0xf] }
  0x6e   :  { %1125 = vmatpush3.bf16.msra.mxu1 %v1164_v10  ;;  %1104 = vmatprep.subr.bf16.mxu0 %v1165_v22  ;;  %v67_v32 = vld [vmem:[#allocation3 + $0x4] sm:$0xf]  ;;  %v130_v33 = vld [vmem:[#allocation5] sm:$0xf]  ;;  %v1044_v35 = vcombine.low %v338_v24, %v339_v25  ;;  %v1176_v3 = vld [vmem:[%s1308_s0 + $0x8] ss:$16 sps:$4 sm:$0xff]  }
  0x6f   :  { %1063 = vst [vmem:[#allocation2 + $0x88] sm:$0xff] %v1062_v23   ;;  %v370_v36 = vadd.bf16 %v306_v29, %v114_v19  ;;  %v371_v37 = vadd.bf16 %v307_v30, %v115_v20  ;;  %v131_v38 = vld [vmem:[#allocation5 + $0x4] sm:$0xf]  ;;  %v194_v39 = vld [vmem:[#allocation7] sm:$0xf]  ;;  %v528_v9 = vshrl.u32 %v527_v7, 7 }
  0x70   :  { %v1166_v34 = vld [vmem:[#allocation2 + $0xc8] sm:$0xff]   ;;  %v195_v40 = vld [vmem:[#allocation7 + $0x4] sm:$0xf]  ;;  %1045 = vst [vmem:[#allocation2 + $0x40] sm:$0xff] %v1044_v35   ;;  %v258_v41 = vmul.bf16 %v194_v39, %v130_v33  ;;  %v98_v43 = vld [vmem:[#allocation3 + $0x80] sm:$0xf] }
  0x71   :  { %1126 = vmatprep.subr.bf16.mxu1 %v1166_v34  ;;  %v259_v42 = vmul.bf16 %v195_v40, %v131_v38  ;;  %v99_v44 = vld [vmem:[#allocation3 + $0x84] sm:$0xf]  ;;  %v162_v45 = vld [vmem:[#allocation5 + $0x80] sm:$0xf]  ;;  %v1076_v47 = vcombine.low %v370_v36, %v371_v37  ;;  %v529_v11 = vsub.s32 0, %v528_v9 }
  0x72   :  { %v322_v48 = vadd.bf16 %v258_v41, %v66_v31  ;;  %v163_v50 = vld [vmem:[#allocation5 + $0x84] sm:$0xf]  ;;  %v226_v51 = vld [vmem:[#allocation7 + $0x80] sm:$0xf] }
  0x73   :  { %v1167_v46 = vld [vmem:[#allocation2 + $0x8] sm:$0xff]   ;;  %v323_v49 = vadd.bf16 %v259_v42, %v67_v32  ;;  %v227_v52 = vld [vmem:[#allocation7 + $0x84] sm:$0xf]  ;;  %1077 = vst [vmem:[#allocation2 + $0xc0] sm:$0xff] %v1076_v47   ;;  %v290_v53 = vmul.bf16 %v226_v51, %v162_v45  ;;  %v1173_v1 = vld [vmem:[%s1308_s0] ss:$16 sps:$4 sm:$0xff]  }
  0x74   :  { %1105 = vmatpush3.bf16.msra.mxu0 %v1167_v46  ;;  %v291_v54 = vmul.bf16 %v227_v52, %v163_v50  ;;  %v1175_v59 = vld [vmem:[%s1308_s0 + $0x4] ss:$16 sps:$4 sm:$0xff]  }
  0x75   :  { %v1029_v56 = vcombine.low %v322_v48, %v323_v49  ;;  %v354_v57 = vadd.bf16 %v290_v53, %v98_v43  ;;  %775 = vmatprep.mubr.bf16.mxu0 %v1175_v59  ;;  %v450_v4 = vld [vmem:[%s1312_s4] sm:$0xff] }
  0x76   :  { %v1168_v55 = vld [vmem:[#allocation2 + $0x88] sm:$0xff]   ;;  %v355_v58 = vadd.bf16 %v291_v54, %v99_v44  ;;  %v452_v5 = vrot.slane %v450_v4, 1 }
  0x77   :  { %1127 = vmatpush3.bf16.msra.mxu1 %v1168_v55  ;;  %873 = vst [vmem:[#allocation2] sm:$0xff] %v1029_v56   ;;  %v1169_v61 = vld [vmem:[#allocation2 + $0x40] sm:$0xff]  }
  0x78   :  { %v1060_v62 = vcombine.low %v354_v57, %v355_v58  ;;  %1106 = vmatprep.subr.bf16.mxu0 %v1169_v61  ;;  %v454_v6 = vmul.f32 %v452_v5, %v450_v4 }
  0x7a   :  { %1061 = vst [vmem:[#allocation2 + $0x80] sm:$0xff] %v1060_v62   ;;  %v1170_v63 = vld [vmem:[#allocation2 + $0xc0] sm:$0xff]   ;;  %v456_v8 = vrot.slane %v454_v6, 1 }
  0x7b   :  { %1128 = vmatprep.subr.bf16.mxu1 %v1170_v63 }
  0x7c   :  { %v458_v10 = vadd.f32 %v456_v8, %v450_v4 }
  0x7e   :  { %v1171_v0 = vld [vmem:[#allocation2] sm:$0xff]   ;;  %v530_v13 = vrot.slane %v458_v10, %v529_v11 }
  0x7f   :  { %1107 = vmatpush3.bf16.msra.mxu0 %v1171_v0 }
  0x81   :  { %v1172_v2 = vld [vmem:[#allocation2 + $0x80] sm:$0xff]  }
  0x82   :  { %1129 = vmatpush3.bf16.msra.mxu1 %v1172_v2  ;;  %776 = vmatmul.mubr.bf16.vlgmr.msra.gmra.mxu0 %v1173_v1 }
  0x85   :  { %817 = vmatmul.mubr.bf16.vlgmr.msra.gmra.mxu1 %v1176_v3 }
 0x142   :  { %v1108_v12 = vpop.f32.mrf.mxu0 }
 0x144   :  { %v1109_v14 = vpop.f32.mrf.mxu0 }
 0x145   :  { %v1130_v15 = vpop.f32.mrf.mxu1  ;;  %v1110_v16 = vadd.f32 %v1109_v14, %v1108_v12 }
 0x146   :  { %v1111_v17 = vpop.f32.mrf.mxu0 }
 0x147   :  { %v778_v18 = vadd.f32 %v1110_v16, %v530_v13  ;;  %v1131_v19 = vpop.f32.mrf.mxu1 }
 0x148   :  { %v1132_v20 = vadd.f32 %v1131_v19, %v1130_v15  ;;  %v1112_v21 = vpop.f32.mrf.mxu0 }
 0x149   :  { %v1133_v22 = vpop.f32.mrf.mxu1  ;;  %v1113_v23 = vadd.f32 %v1112_v21, %v1111_v17 }
 0x14a   :  { %v819_v24 = vadd.f32 %v1132_v20, %v778_v18 }
 0x14b   :  { %v781_v25 = vadd.f32 %v1113_v23, %v530_v13  ;;  %v1134_v26 = vpop.f32.mrf.mxu1 }
 0x14c   :  { %825 = vst [vmem:[%s1313_s5] sm:$0xff] %v819_v24  ;;  %v1135_v27 = vadd.f32 %v1134_v26, %v1133_v22 }
 0x14e   :  { %v822_v28 = vadd.f32 %v1135_v27, %v781_v25 }
 0x150   :  { %826 = vst [vmem:[%s1313_s5 + $0x8] sm:$0xff] %v822_v28 }
 0x151   :  { %831 = vsyncpa [#allocation4], 1 }
 0x152   :  { %832 = vsyncpa [#allocation6], 1 }

</bundles_post_ra>
